<compile_context>
chip_gen: v7x
topology: tpu7x:2x2x1
jax: 0.10.0
libtpu: 0.0.40
codegen_flags: <defaults>
</compile_context>

<pallas_src>
import jax
import jax.numpy as jnp
from jax.experimental import pallas as pl
from jax.experimental.pallas import tpu as pltpu


def _mlp_stack_kernel(x_ref, p_ref, o_ref):
    """One invocation applies all L (Linear -> ReLU) layers.

    x_ref: (B, F)        input activations
    p_ref: (L, F+1, F)   per-layer params: rows 0..F-1 are the weight matrix
                         pre-transposed to (in, out); row F is the bias.
    o_ref: (B, F)        output activations
    """
    n_layers, f_in_p1, _ = p_ref.shape
    f_in = f_in_p1 - 1

    h = x_ref[...]                              # (B, F)

    # Static (trace-time) unroll over layers. Only the live layer's params
    # are loaded from the Ref (zero-cost static indexing), keeping vreg
    # pressure O(1) in L. Each layer is F broadcast multiply-adds on the VPU
    # plus a ReLU select; no MXU, no transpose, no per-layer DMA.
    for l in range(n_layers):
        wl = p_ref[l]                           # (F+1, F) -- live layer only
        acc = wl[f_in:f_in + 1, :]              # bias row (1, F), bcast over B
        for i in range(f_in):
            acc = acc + h[:, i:i + 1] * wl[i:i + 1, :]   # (B,1)*(1,F)
        h = jnp.maximum(acc, 0.0)

    o_ref[...] = h


def net_forward(x, weights, biases):
    """
    x:       (B, F)    float32
    weights: (L, F, F) float32, PyTorch layout (out_features, in_features)
    biases:  (L, F)    float32
    returns: (B, F)    float32
    """
    B, F = x.shape
    L = weights.shape[0]

    # Wrapper-side packing (one-time, outside the kernel):
    #   * transpose weights to (in, out) so the kernel contracts directly,
    #   * append the bias as an extra row -> single (L, F+1, F) param tensor,
    #     halving the number of parameter DMAs into VMEM.
    wt = jnp.swapaxes(weights, 1, 2)            # (L, in, out)
    params = jnp.concatenate([wt, biases.reshape(L, 1, F)], axis=1)  # (L, F+1, F)

    return pl.pallas_call(
        _mlp_stack_kernel,
        out_shape=jax.ShapeDtypeStruct((B, F), jnp.float32),
        in_specs=[
            pl.BlockSpec(memory_space=pltpu.MemorySpace.VMEM),  # activations
            pl.BlockSpec(memory_space=pltpu.MemorySpace.VMEM),  # packed params
        ],
        out_specs=pl.BlockSpec(memory_space=pltpu.MemorySpace.VMEM),
    )(x, params)


def _reference(x, weights, biases):
    for l in range(weights.shape[0]):
        x = jnp.maximum(x @ weights[l].T + biases[l], 0.0)
    return x


if __name__ == "__main__":
    n_modules = 4
    B, F = 2, 2  # matches nn.Linear(in_features=2, out_features=2)

    # Input from the PyTorch spec (deterministic).
    x = jnp.array([[-4.0, 5.0], [6.0, -7.0]], dtype=jnp.float32)

    # Deterministic synthetic parameters (PyTorch layout: (out, in) per layer).
    key = jax.random.PRNGKey(0)
    kw, kb = jax.random.split(key, 2)
    weights = jax.random.uniform(
        kw, (n_modules, F, F), dtype=jnp.float32, minval=-0.7, maxval=0.7
    )
    biases = jax.random.uniform(
        kb, (n_modules, F), dtype=jnp.float32, minval=-0.7, maxval=0.7
    )

    out = net_forward(x, weights, biases)
    out = jax.block_until_ready(out)

    ref = _reference(x, weights, biases)
    assert out.shape == (B, F)
    assert jnp.allclose(out, ref, atol=1e-5, rtol=1e-5)

    print("KERNEL_OK")
</pallas_src>

<mosaic_0001>
module attributes {stable_mosaic.version = 11 : i64} {
  func.func @_mlp_stack_kernel(%arg0: memref<2x2xf32, #tpu.memory_space<vmem>>, %arg1: memref<4x3x2xf32, #tpu.memory_space<vmem>>, %arg2: memref<2x2xf32, #tpu.memory_space<vmem>>) attributes {dimension_semantics = [], scalar_prefetch = 0 : i64, scratch_operands = 0 : i64, tpu.core_type = #tpu.core_type<tc>} {
    %c0 = arith.constant 0 : index
    %c0_0 = arith.constant 0 : index
    %0 = vector.load %arg0[%c0, %c0_0] : memref<2x2xf32, #tpu.memory_space<vmem>>, vector<2x2xf32>
    %c0_1 = arith.constant 0 : index
    %c0_2 = arith.constant 0 : index
    %c0_3 = arith.constant 0 : index
    %1 = vector.load %arg1[%c0_1, %c0_2, %c0_3] : memref<4x3x2xf32, #tpu.memory_space<vmem>>, vector<1x3x2xf32>
    %2 = vector.shape_cast %1 : vector<1x3x2xf32> to vector<3x2xf32>
    %3 = vector.extract_strided_slice %2 {offsets = [2, 0], sizes = [1, 2], strides = [1, 1]} : vector<3x2xf32> to vector<1x2xf32>
    %4 = vector.extract_strided_slice %0 {offsets = [0, 0], sizes = [2, 1], strides = [1, 1]} : vector<2x2xf32> to vector<2x1xf32>
    %5 = vector.extract_strided_slice %2 {offsets = [0, 0], sizes = [1, 2], strides = [1, 1]} : vector<3x2xf32> to vector<1x2xf32>
    %6 = vector.broadcast %4 : vector<2x1xf32> to vector<2x2xf32>
    %7 = vector.broadcast %5 : vector<1x2xf32> to vector<2x2xf32>
    %8 = arith.mulf %6, %7 : vector<2x2xf32>
    %9 = vector.broadcast %3 : vector<1x2xf32> to vector<2x2xf32>
    %10 = arith.addf %9, %8 : vector<2x2xf32>
    %11 = vector.extract_strided_slice %0 {offsets = [0, 1], sizes = [2, 1], strides = [1, 1]} : vector<2x2xf32> to vector<2x1xf32>
    %12 = vector.extract_strided_slice %2 {offsets = [1, 0], sizes = [1, 2], strides = [1, 1]} : vector<3x2xf32> to vector<1x2xf32>
    %13 = vector.broadcast %11 : vector<2x1xf32> to vector<2x2xf32>
    %14 = vector.broadcast %12 : vector<1x2xf32> to vector<2x2xf32>
    %15 = arith.mulf %13, %14 : vector<2x2xf32>
    %16 = arith.addf %10, %15 : vector<2x2xf32>
    %cst = arith.constant 0.000000e+00 : f32
    %17 = vector.broadcast %cst : f32 to vector<2x2xf32>
    %18 = arith.maximumf %16, %17 : vector<2x2xf32>
    %c1 = arith.constant 1 : index
    %c0_4 = arith.constant 0 : index
    %c0_5 = arith.constant 0 : index
    %19 = vector.load %arg1[%c1, %c0_4, %c0_5] : memref<4x3x2xf32, #tpu.memory_space<vmem>>, vector<1x3x2xf32>
    %20 = vector.shape_cast %19 : vector<1x3x2xf32> to vector<3x2xf32>
    %21 = vector.extract_strided_slice %20 {offsets = [2, 0], sizes = [1, 2], strides = [1, 1]} : vector<3x2xf32> to vector<1x2xf32>
    %22 = vector.extract_strided_slice %18 {offsets = [0, 0], sizes = [2, 1], strides = [1, 1]} : vector<2x2xf32> to vector<2x1xf32>
    %23 = vector.extract_strided_slice %20 {offsets = [0, 0], sizes = [1, 2], strides = [1, 1]} : vector<3x2xf32> to vector<1x2xf32>
    %24 = vector.broadcast %22 : vector<2x1xf32> to vector<2x2xf32>
    %25 = vector.broadcast %23 : vector<1x2xf32> to vector<2x2xf32>
    %26 = arith.mulf %24, %25 : vector<2x2xf32>
    %27 = vector.broadcast %21 : vector<1x2xf32> to vector<2x2xf32>
    %28 = arith.addf %27, %26 : vector<2x2xf32>
    %29 = vector.extract_strided_slice %18 {offsets = [0, 1], sizes = [2, 1], strides = [1, 1]} : vector<2x2xf32> to vector<2x1xf32>
    %30 = vector.extract_strided_slice %20 {offsets = [1, 0], sizes = [1, 2], strides = [1, 1]} : vector<3x2xf32> to vector<1x2xf32>
    %31 = vector.broadcast %29 : vector<2x1xf32> to vector<2x2xf32>
    %32 = vector.broadcast %30 : vector<1x2xf32> to vector<2x2xf32>
    %33 = arith.mulf %31, %32 : vector<2x2xf32>
    %34 = arith.addf %28, %33 : vector<2x2xf32>
    %cst_6 = arith.constant 0.000000e+00 : f32
    %35 = vector.broadcast %cst_6 : f32 to vector<2x2xf32>
    %36 = arith.maximumf %34, %35 : vector<2x2xf32>
    %c2 = arith.constant 2 : index
    %c0_7 = arith.constant 0 : index
    %c0_8 = arith.constant 0 : index
    %37 = vector.load %arg1[%c2, %c0_7, %c0_8] : memref<4x3x2xf32, #tpu.memory_space<vmem>>, vector<1x3x2xf32>
    %38 = vector.shape_cast %37 : vector<1x3x2xf32> to vector<3x2xf32>
    %39 = vector.extract_strided_slice %38 {offsets = [2, 0], sizes = [1, 2], strides = [1, 1]} : vector<3x2xf32> to vector<1x2xf32>
    %40 = vector.extract_strided_slice %36 {offsets = [0, 0], sizes = [2, 1], strides = [1, 1]} : vector<2x2xf32> to vector<2x1xf32>
    %41 = vector.extract_strided_slice %38 {offsets = [0, 0], sizes = [1, 2], strides = [1, 1]} : vector<3x2xf32> to vector<1x2xf32>
    %42 = vector.broadcast %40 : vector<2x1xf32> to vector<2x2xf32>
    %43 = vector.broadcast %41 : vector<1x2xf32> to vector<2x2xf32>
    %44 = arith.mulf %42, %43 : vector<2x2xf32>
    %45 = vector.broadcast %39 : vector<1x2xf32> to vector<2x2xf32>
    %46 = arith.addf %45, %44 : vector<2x2xf32>
    %47 = vector.extract_strided_slice %36 {offsets = [0, 1], sizes = [2, 1], strides = [1, 1]} : vector<2x2xf32> to vector<2x1xf32>
    %48 = vector.extract_strided_slice %38 {offsets = [1, 0], sizes = [1, 2], strides = [1, 1]} : vector<3x2xf32> to vector<1x2xf32>
    %49 = vector.broadcast %47 : vector<2x1xf32> to vector<2x2xf32>
    %50 = vector.broadcast %48 : vector<1x2xf32> to vector<2x2xf32>
    %51 = arith.mulf %49, %50 : vector<2x2xf32>
    %52 = arith.addf %46, %51 : vector<2x2xf32>
    %cst_9 = arith.constant 0.000000e+00 : f32
    %53 = vector.broadcast %cst_9 : f32 to vector<2x2xf32>
    %54 = arith.maximumf %52, %53 : vector<2x2xf32>
    %c3 = arith.constant 3 : index
    %c0_10 = arith.constant 0 : index
    %c0_11 = arith.constant 0 : index
    %55 = vector.load %arg1[%c3, %c0_10, %c0_11] : memref<4x3x2xf32, #tpu.memory_space<vmem>>, vector<1x3x2xf32>
    %56 = vector.shape_cast %55 : vector<1x3x2xf32> to vector<3x2xf32>
    %57 = vector.extract_strided_slice %56 {offsets = [2, 0], sizes = [1, 2], strides = [1, 1]} : vector<3x2xf32> to vector<1x2xf32>
    %58 = vector.extract_strided_slice %54 {offsets = [0, 0], sizes = [2, 1], strides = [1, 1]} : vector<2x2xf32> to vector<2x1xf32>
    %59 = vector.extract_strided_slice %56 {offsets = [0, 0], sizes = [1, 2], strides = [1, 1]} : vector<3x2xf32> to vector<1x2xf32>
    %60 = vector.broadcast %58 : vector<2x1xf32> to vector<2x2xf32>
    %61 = vector.broadcast %59 : vector<1x2xf32> to vector<2x2xf32>
    %62 = arith.mulf %60, %61 : vector<2x2xf32>
    %63 = vector.broadcast %57 : vector<1x2xf32> to vector<2x2xf32>
    %64 = arith.addf %63, %62 : vector<2x2xf32>
    %65 = vector.extract_strided_slice %54 {offsets = [0, 1], sizes = [2, 1], strides = [1, 1]} : vector<2x2xf32> to vector<2x1xf32>
    %66 = vector.extract_strided_slice %56 {offsets = [1, 0], sizes = [1, 2], strides = [1, 1]} : vector<3x2xf32> to vector<1x2xf32>
    %67 = vector.broadcast %65 : vector<2x1xf32> to vector<2x2xf32>
    %68 = vector.broadcast %66 : vector<1x2xf32> to vector<2x2xf32>
    %69 = arith.mulf %67, %68 : vector<2x2xf32>
    %70 = arith.addf %64, %69 : vector<2x2xf32>
    %cst_12 = arith.constant 0.000000e+00 : f32
    %71 = vector.broadcast %cst_12 : f32 to vector<2x2xf32>
    %72 = arith.maximumf %70, %71 : vector<2x2xf32>
    %c0_13 = arith.constant 0 : index
    %c0_14 = arith.constant 0 : index
    %73 = vector.load %arg2[%c0_13, %c0_14] : memref<2x2xf32, #tpu.memory_space<vmem>>, vector<2x2xf32>
    tpu.vector_store %arg2[%c0_13, %c0_14], %72 {strides = array<i32>} : memref<2x2xf32, #tpu.memory_space<vmem>>, vector<2x2xf32>,
    return
  }
}

</mosaic_0001>

<bundles_post_ra>
// kernel: tpu_custom_call.1
= control target key start
LH: loop header
LB: loop body
LE: loop exit
PB: predicated region body
PF: predicated region fallthrough
CT: control target
= control target key end

     0   :  { %v175_v1 = vmov 0   ;;  %s220_s0 = inlined_call_operand.vmem [shape: f32[2,2], index: 0, kind: input, shape index: {}]   ;;  %s221_s1 = inlined_call_operand.vmem [shape: f32[4,3,2], index: 1, kind: input, shape index: {}]   ;;  %s222_s2 = inlined_call_operand.hbm [shape: f32[2,2], index: 2, kind: output, shape index: {}]  }
   0x1   :  { %v12_v0 = vld [vmem:[%s220_s0] sm:$0x3]  ;;  %146 = vset.pattern.permute.xlu0 %v175_v1  ;;  %148 = vset.pattern.permute.xlu1 %v175_v1 }
   0x2   :  { %7 = vsyncpa [#allocation3], 0  ;;  %16 = vperm.xlu0 %146, %v12_v0   ;;  %v176_v2 = vmov 1   ;;  %v19_v3 = vlaneseq  ;;  %v13_v6 = vld [vmem:[%s221_s1] sm:$0x7]  ;;  %s177_s18 = smov [#allocation2]  }
   0x3   :  { %v140_v19 = vld [vmem:[%s221_s1 + $0x4] sm:$0x7]  ;;  %v141_v30 = vld [vmem:[%s221_s1 + $0x8] sm:$0x7]  ;;  %v142_v41 = vld [vmem:[%s221_s1 + $0xc] sm:$0x7] }
   0x4   :  { %v20_v4 = vshrl.u32 %v19_v3, 7  ;;  %s132_s19 = sshll.u32 %s177_s18, 4  ;;  %vm124_vm0 = vcmask 9216   ;;  %s133_s19 = int_to_ptr.vmem [resolvable:$true] %s132_s19 }
   0x5   :  { %s151_s20 = scalar_lea.vmem %s133_s19, 32  ;;  %p156_p1 = scmp.lt.s32.totalorder %s133_s19, %s133_s19 }
   0x6   :  { %147 = vset.pattern.permute.xlu0 %v176_v2  ;;  %v21_v5 = vsub.s32 0, %v20_v4  ;;  %v26_v8 = vsub.s32 2, %v20_v4  ;;  %v35_v9 = vsub.s32 1, %v20_v4  ;;  %p152_p0 = scmp.ne.s32.totalorder %s133_s19, %s151_s20  ;;  %p157_p2 = scmp.lt.s32.totalorder %s151_s20, %s151_s20 }
   0x7   :  { %30 = vperm.xlu0 %147, %v12_v0  }
   0x8   :  { %v22_v7 = vrot.slane %v13_v6, %v21_v5  ;;  %v27_v11 = vrot.slane %v13_v6, %v26_v8  ;;  %v36_v13 = vrot.slane %v13_v6, %v35_v9  ;;  %v50_v20 = vrot.slane %v140_v19, %v21_v5  ;;  %p158_p3 = por %p157_p2, %p156_p1 }
   0x9   :  { %v55_v22 = vrot.slane %v140_v19, %v26_v8  ;;  %v64_v24 = vrot.slane %v140_v19, %v35_v9  ;;  %v78_v31 = vrot.slane %v141_v30, %v21_v5  ;;  %v92_v32 = vrot.slane %v141_v30, %v35_v9 }
   0xa   :  { %v83_v33 = vrot.slane %v141_v30, %v26_v8  ;;  %v106_v42 = vrot.slane %v142_v41, %v21_v5  ;;  %v120_v43 = vrot.slane %v142_v41, %v35_v9  ;;  %v111_v44 = vrot.slane %v142_v41, %v26_v8  ;;  %p159_p4 = pnand %p158_p3, %p152_p0 }
  0x81   :  { %v17_v10 = vpop.permute.xlu0 %16 }
  0x82   :  { %v23_v12 = vmul.f32 %v22_v7, %v17_v10 }
  0x84   :  { %v28_v15 = vadd.f32 %v27_v11, %v23_v12 }
  0x86   :  { %v31_v14 = vpop.permute.xlu0 %30 }
  0x87   :  { %v37_v16 = vmul.f32 %v36_v13, %v31_v14 }
  0x89   :  { %v38_v17 = vadd.f32 %v37_v16, %v28_v15 }
  0x8b   :  { %v39_v18 = vmax.f32 %v38_v17, 0.0 }
  0x8d   :  { %44 = vperm.xlu1 %148, %v39_v18  }
  0x91   :  { %149 = vset.pattern.permute.xlu1 %v176_v2 }
  0x92   :  { %58 = vperm.xlu1 %149, %v39_v18  }
  0x96   :  { %150 = vset.pattern.permute.xlu1 %v175_v1 }
 0x10c   :  { %v45_v21 = vpop.permute.xlu1 %44 }
 0x10d   :  { %v51_v23 = vmul.f32 %v50_v20, %v45_v21 }
 0x10f   :  { %v56_v26 = vadd.f32 %v55_v22, %v51_v23 }
 0x111   :  { %v59_v25 = vpop.permute.xlu1 %58 }
 0x112   :  { %v65_v27 = vmul.f32 %v64_v24, %v59_v25 }
 0x114   :  { %v66_v28 = vadd.f32 %v65_v27, %v56_v26 }
 0x116   :  { %v67_v29 = vmax.f32 %v66_v28, 0.0 }
 0x118   :  { %86 = vperm.xlu0 %147, %v67_v29   ;;  %72 = vperm.xlu1 %150, %v67_v29  }
 0x197   :  { %v87_v34 = vpop.permute.xlu0 %86  ;;  %v73_v35 = vpop.permute.xlu1 %72 }
 0x198   :  { %v79_v36 = vmul.f32 %v78_v31, %v73_v35  ;;  %v93_v37 = vmul.f32 %v92_v32, %v87_v34 }
 0x19a   :  { %v84_v38 = vadd.f32 %v83_v33, %v79_v36 }
 0x19c   :  { %v94_v39 = vadd.f32 %v93_v37, %v84_v38 }
 0x19e   :  { %v95_v40 = vmax.f32 %v94_v39, 0.0 }
 0x1a0   :  { %114 = vperm.xlu0 %147, %v95_v40   ;;  %100 = vperm.xlu1 %150, %v95_v40  }
 0x21f   :  { %v115_v45 = vpop.permute.xlu0 %114  ;;  %v101_v46 = vpop.permute.xlu1 %100 }
 0x220   :  { %v107_v47 = vmul.f32 %v106_v42, %v101_v46  ;;  %v121_v48 = vmul.f32 %v120_v43, %v115_v45 }
 0x222   :  { %v112_v49 = vadd.f32 %v111_v44, %v107_v47 }
 0x224   :  { %v122_v50 = vadd.f32 %v121_v48, %v112_v49 }
 0x226   :  { %v123_v51 = vmax.f32 %v122_v50, 0.0 }
 0x228   :  { %125 = vst.msk [vmem:[#allocation2] sm:$0x3] %vm124_vm0, %v123_v51 }
 0x229   :  { %162 = shalt.err (!%p159_p4)
}
 0x22a   :  { %s163_s22 = scalar_lea.hbm %s222_s2, 32 }
 0x22b   :  { %p164_p5 = scmp.ne.s32.totalorder %s222_s2, %s163_s22  ;;  %p167_p6 = scmp.lt.u32.totalorder %s163_s22, %s222_s2 }
 0x22d   :  { %p169_p7 = pnand %p167_p6, %p164_p5 }
 0x22f   :  { %172 = shalt.err (!%p169_p7)
}
 0x230   :  { %135 = dma.vmem_to_hbm [thread:$0]  %s133_s19, 32, %s222_s2, [#allocation3]  }
 0x231   :  { %173 = dma.done.wait [#allocation3], 32  }
 0x232   :  { %174 = vsyncadd [#allocation3], 4294967264 }
 0x233   :  { %139 = vsyncpa [#allocation3], 1 }

</bundles_post_ra>
